<compile_context>
chip_gen: v7x
topology: tpu7x:2x2x1
jax: 0.10.0
libtpu: 0.0.40
codegen_flags: <defaults>
</compile_context>

<pallas_src>
import functools

import jax
import jax.numpy as jnp
from jax.experimental import pallas as pl
from jax.experimental.pallas import tpu as pltpu

_LANES = 128
_SUBLANES = 8


def _round_up(x, m):
    return ((x + m - 1) // m) * m


def _broadcast_kernel(col_ref, op_ref, col_out_hbm, op_out_hbm, sem,
                      *, batch_size, rows_c, rows_o):
    """Copy the current parameter tile into every batch element of the outputs.

    col_ref: (rows_c, 128) VMEM   lane-dense DC-color tile (flattened (n,3))
    op_ref:  (rows_o, 128) VMEM   lane-dense opacity tile  (flattened (n,1))
    col_out_hbm: (B, 3*mo_pad, 128) HBM (memory_space=pl.ANY)
    op_out_hbm:  (B, mo_pad, 128)   HBM (memory_space=pl.ANY)
    sem: (B, 2) DMA semaphores.

    2*B VMEM->HBM DMAs per grid step; all started, then all waited.  No
    vector loads/stores at all.
    """
    i = pl.program_id(0)
    c0 = i * rows_c
    o0 = i * rows_o
    # Row offsets are sublane-aligned whenever the tile rows are (static check).
    if rows_c % _SUBLANES == 0:
        c0 = pl.multiple_of(c0, _SUBLANES)
    if rows_o % _SUBLANES == 0:
        o0 = pl.multiple_of(o0, _SUBLANES)

    copies = []
    for b in range(batch_size):  # batch_size is a small static int
        cc = pltpu.make_async_copy(
            col_ref, col_out_hbm.at[b, pl.ds(c0, rows_c), :], sem.at[b, 0])
        co = pltpu.make_async_copy(
            op_ref, op_out_hbm.at[b, pl.ds(o0, rows_o), :], sem.at[b, 1])
        cc.start()
        co.start()
        copies.append((cc, co))
    # Wait on everything before the step ends (input buffer may be recycled by
    # the auto-pipeline afterwards).  The B copies overlap with each other.
    for cc, co in copies:
        cc.wait()
        co.wait()


@functools.partial(jax.jit, static_argnames=("batch_size", "gaussians_per_tile"))
def gaussian_forward(sh_coefficients, opacities, batch_size, *,
                     gaussians_per_tile=131072):
    """Pallas implementation of GaussianModel.forward.

    Args:
      sh_coefficients: (N, 3*(sh_degree+1)^2) float32
      opacities:       (N, 1) float32
      batch_size:      int (== viewpoints.shape[0]; viewpoint values are unused
                       by the reference forward())
    Returns:
      colors    (batch_size, N, 3)
      opacities (batch_size, N, 1)
    """
    n, _sh_size = sh_coefficients.shape

    # Only the SH DC term is used by forward(); slice before the kernel so the
    # remaining columns are never DMA'd.
    colors_dc = sh_coefficients[:, 0:3]   # (n, 3)
    opac_row = opacities[:, 0]            # (n,)

    # --- Tile geometry (minimize padding, keep >= ~2 MiB of work per step) ---
    mo = pl.cdiv(n, _LANES)                       # lane-dense rows of opacity
    target_rows = max(1, gaussians_per_tile // _LANES)
    if mo <= target_rows:
        n_tiles = 1
        mo_tile = mo          # block == full array: no sublane-divisibility needed
    else:
        n_tiles = pl.cdiv(mo, target_rows)
        mo_tile = _round_up(pl.cdiv(mo, n_tiles), _SUBLANES)
        n_tiles = pl.cdiv(mo, mo_tile)
    mo_pad = mo_tile * n_tiles
    n_pad = mo_pad * _LANES

    if n_pad != n:
        colors_dc = jnp.pad(colors_dc, ((0, n_pad - n), (0, 0)))
        opac_row = jnp.pad(opac_row, (0, n_pad - n))

    # Lane-dense slabs: (n_pad, 3) -> (3*mo_pad, 128); (n_pad,) -> (mo_pad, 128).
    # The interleaved [r,g,b,...] order is exactly the flattening of (N, 3).
    colors_flat = colors_dc.reshape(3 * mo_pad, _LANES)
    opac_flat = opac_row.reshape(mo_pad, _LANES)

    rows_c = 3 * mo_tile
    rows_o = mo_tile

    kernel = functools.partial(_broadcast_kernel, batch_size=batch_size,
                               rows_c=rows_c, rows_o=rows_o)

    # Input double-buffered VMEM = 2 * (rows_c + rows_o) * 128 * 4 B (~4 MiB at
    # the default tile) — well under the scoped-VMEM default on v5e/v6e/v7x, so
    # no explicit vmem_limit_bytes is needed.  Outputs never touch VMEM.
    col_out, op_out = pl.pallas_call(
        kernel,
        out_shape=(
            jax.ShapeDtypeStruct((batch_size, 3 * mo_pad, _LANES), jnp.float32),
            jax.ShapeDtypeStruct((batch_size, mo_pad, _LANES), jnp.float32),
        ),
        grid_spec=pltpu.PrefetchScalarGridSpec(
            num_scalar_prefetch=0,
            grid=(n_tiles,),
            in_specs=[
                pl.BlockSpec((rows_c, _LANES), lambda i: (i, 0)),
                pl.BlockSpec((rows_o, _LANES), lambda i: (i, 0)),
            ],
            out_specs=(
                pl.BlockSpec(memory_space=pl.ANY),
                pl.BlockSpec(memory_space=pl.ANY),
            ),
            scratch_shapes=[pltpu.SemaphoreType.DMA((batch_size, 2))],
        ),
        compiler_params=pltpu.CompilerParams(
            # Gaussian-tile axis parallel: on v7x each TensorCore owns a
            # disjoint contiguous output range and its own parameter tiles.
            dimension_semantics=("parallel",),
        ),
    )(colors_flat, opac_flat)

    # Free reshapes back to the PyTorch (B, N, 3) / (B, N, 1) layout; the slice
    # is only emitted when padding actually occurred.
    colors = col_out.reshape(batch_size, n_pad, 3)
    opacs = op_out.reshape(batch_size, n_pad, 1)
    if n_pad != n:
        colors = colors[:, :n, :]
        opacs = opacs[:, :n, :]
    return colors, opacs


def init_gaussian_params(key, num_gaussians, initial_radius=0.1,
                         opacity_init=0.1, sh_degree=3):
    """Deterministic parameter init mirroring GaussianModel._init_parameters."""
    positions = jax.random.normal(key, (num_gaussians, 3), jnp.float32) * initial_radius
    scaling = jnp.ones((num_gaussians, 3), jnp.float32) * initial_radius
    rotations = jnp.zeros((num_gaussians, 4), jnp.float32).at[:, 0].set(1.0)
    opacities = jnp.ones((num_gaussians, 1), jnp.float32) * opacity_init
    sh_size = 3 * (sh_degree + 1) ** 2
    sh_coefficients = jnp.zeros((num_gaussians, sh_size), jnp.float32).at[:, 0:3].set(0.5)
    return dict(
        positions=positions,
        scaling=scaling,
        rotations=rotations,
        opacities=opacities,
        sh_coefficients=sh_coefficients,
    )


def _reference_forward(sh_coefficients, opacities, batch_size):
    n = sh_coefficients.shape[0]
    ref_colors = jnp.broadcast_to(sh_coefficients[:, 0:3][None], (batch_size, n, 3))
    ref_opac = jnp.broadcast_to(opacities[None], (batch_size, n, 1))
    return ref_colors, ref_opac


if __name__ == "__main__":
    key = jax.random.PRNGKey(0)

    # Small shapes consistent with the module.
    num_gaussians = 256
    sh_degree = 3
    batch_size = 2

    params = init_gaussian_params(
        key, num_gaussians, initial_radius=0.1, opacity_init=0.1, sh_degree=sh_degree
    )

    # viewpoints: (batch_size, 3) -- only its batch size matters in forward().
    viewpoints = jax.random.normal(jax.random.PRNGKey(1), (batch_size, 3), jnp.float32)

    # 1) N multiple of 128, single tile: no padding, no post-kernel slice.
    colors, opac = gaussian_forward(
        params["sh_coefficients"], params["opacities"], viewpoints.shape[0]
    )
    jax.block_until_ready((colors, opac))
    ref_colors, ref_opac = _reference_forward(
        params["sh_coefficients"], params["opacities"], batch_size
    )
    assert colors.shape == (batch_size, num_gaussians, 3)
    assert opac.shape == (batch_size, num_gaussians, 1)
    assert jnp.allclose(colors, ref_colors)
    assert jnp.allclose(opac, ref_opac)

    # 2) Padding path (N not a multiple of 128).
    n2 = 200
    params2 = init_gaussian_params(jax.random.PRNGKey(2), n2, sh_degree=sh_degree)
    colors2, opac2 = gaussian_forward(
        params2["sh_coefficients"], params2["opacities"], batch_size
    )
    jax.block_until_ready((colors2, opac2))
    ref_colors2, ref_opac2 = _reference_forward(
        params2["sh_coefficients"], params2["opacities"], batch_size
    )
    assert colors2.shape == (batch_size, n2, 3)
    assert opac2.shape == (batch_size, n2, 1)
    assert jnp.allclose(colors2, ref_colors2)
    assert jnp.allclose(opac2, ref_opac2)

    # 3) Multi-tile path (exercises the dynamic DMA row offsets).
    n3 = 5000
    params3 = init_gaussian_params(jax.random.PRNGKey(3), n3, sh_degree=sh_degree)
    colors3, opac3 = gaussian_forward(
        params3["sh_coefficients"], params3["opacities"], batch_size,
        gaussians_per_tile=1024,
    )
    jax.block_until_ready((colors3, opac3))
    ref_colors3, ref_opac3 = _reference_forward(
        params3["sh_coefficients"], params3["opacities"], batch_size
    )
    assert colors3.shape == (batch_size, n3, 3)
    assert opac3.shape == (batch_size, n3, 1)
    assert jnp.allclose(colors3, ref_colors3)
    assert jnp.allclose(opac3, ref_opac3)

    # TODO(synk): get_covariance_matrices (quaternion->R, bmm), densify, prune
    # are not part of forward(); not implemented here.
    print("KERNEL_OK")
</pallas_src>

<mosaic_0001>
module attributes {stable_mosaic.version = 11 : i64} {
  func.func @_broadcast_kernel(%arg0: i32, %arg1: memref<6x128xf32, #tpu.memory_space<vmem>>, %arg2: memref<2x128xf32, #tpu.memory_space<vmem>>, %arg3: memref<2x6x128xf32, #tpu.memory_space<any>>, %arg4: memref<2x2x128xf32, #tpu.memory_space<any>>, %arg5: memref<2x2x!tpu.dma_semaphore, #tpu.memory_space<semaphore_mem>>) attributes {dimension_semantics = [#tpu.dimension_semantics<parallel>], iteration_bounds = array<i64: 1>, scalar_prefetch = 0 : i64, scratch_operands = 1 : i64, tpu.core_type = #tpu.core_type<tc>, window_params = [{transform_indices = @transform_0, window_bounds = array<i64: 6, 128>}, {transform_indices = @transform_1, window_bounds = array<i64: 2, 128>}, {}, {}]} {
    %c6_i32 = arith.constant 6 : i32
    %0 = arith.muli %arg0, %c6_i32 : i32
    %c2_i32 = arith.constant 2 : i32
    %1 = arith.muli %arg0, %c2_i32 : i32
    %c0_i32 = arith.constant 0 : i32
    %c0_i32_0 = arith.constant 0 : i32
    %c0_i32_1 = arith.constant 0 : i32
    %c0_i32_2 = arith.constant 0 : i32
    %2 = tpu.memref_slice %arg3[%c0_i32, %0, %c0_i32_2] : memref<2x6x128xf32, #tpu.memory_space<any>> -> memref<1x6x128xf32, #tpu.memory_space<any>>
    %3 = tpu.memref_squeeze %2 : memref<1x6x128xf32, #tpu.memory_space<any>> -> memref<6x128xf32, #tpu.memory_space<any>>
    %4 = tpu.memref_slice %arg5[%c0_i32_0, %c0_i32_1] : memref<2x2x!tpu.dma_semaphore, #tpu.memory_space<semaphore_mem>> -> memref<1x1x!tpu.dma_semaphore, #tpu.memory_space<semaphore_mem>>
    %5 = tpu.memref_squeeze %4 : memref<1x1x!tpu.dma_semaphore, #tpu.memory_space<semaphore_mem>> -> memref<!tpu.dma_semaphore, #tpu.memory_space<semaphore_mem>>
    tpu.enqueue_dma source(%arg1 : memref<6x128xf32, #tpu.memory_space<vmem>>) target(%3 : memref<6x128xf32, #tpu.memory_space<any>>) target_semaphore(%5 : memref<!tpu.dma_semaphore, #tpu.memory_space<semaphore_mem>>)
    %c0_i32_3 = arith.constant 0 : i32
    %c0_i32_4 = arith.constant 0 : i32
    %c1_i32 = arith.constant 1 : i32
    %c0_i32_5 = arith.constant 0 : i32
    %6 = tpu.memref_slice %arg4[%c0_i32_3, %1, %c0_i32_5] : memref<2x2x128xf32, #tpu.memory_space<any>> -> memref<1x2x128xf32, #tpu.memory_space<any>>
    %7 = tpu.memref_squeeze %6 : memref<1x2x128xf32, #tpu.memory_space<any>> -> memref<2x128xf32, #tpu.memory_space<any>>
    %8 = tpu.memref_slice %arg5[%c0_i32_4, %c1_i32] : memref<2x2x!tpu.dma_semaphore, #tpu.memory_space<semaphore_mem>> -> memref<1x1x!tpu.dma_semaphore, #tpu.memory_space<semaphore_mem>>
    %9 = tpu.memref_squeeze %8 : memref<1x1x!tpu.dma_semaphore, #tpu.memory_space<semaphore_mem>> -> memref<!tpu.dma_semaphore, #tpu.memory_space<semaphore_mem>>
    tpu.enqueue_dma source(%arg2 : memref<2x128xf32, #tpu.memory_space<vmem>>) target(%7 : memref<2x128xf32, #tpu.memory_space<any>>) target_semaphore(%9 : memref<!tpu.dma_semaphore, #tpu.memory_space<semaphore_mem>>)
    %c1_i32_6 = arith.constant 1 : i32
    %c1_i32_7 = arith.constant 1 : i32
    %c0_i32_8 = arith.constant 0 : i32
    %c0_i32_9 = arith.constant 0 : i32
    %10 = tpu.memref_slice %arg3[%c1_i32_6, %0, %c0_i32_9] : memref<2x6x128xf32, #tpu.memory_space<any>> -> memref<1x6x128xf32, #tpu.memory_space<any>>
    %11 = tpu.memref_squeeze %10 : memref<1x6x128xf32, #tpu.memory_space<any>> -> memref<6x128xf32, #tpu.memory_space<any>>
    %12 = tpu.memref_slice %arg5[%c1_i32_7, %c0_i32_8] : memref<2x2x!tpu.dma_semaphore, #tpu.memory_space<semaphore_mem>> -> memref<1x1x!tpu.dma_semaphore, #tpu.memory_space<semaphore_mem>>
    %13 = tpu.memref_squeeze %12 : memref<1x1x!tpu.dma_semaphore, #tpu.memory_space<semaphore_mem>> -> memref<!tpu.dma_semaphore, #tpu.memory_space<semaphore_mem>>
    tpu.enqueue_dma source(%arg1 : memref<6x128xf32, #tpu.memory_space<vmem>>) target(%11 : memref<6x128xf32, #tpu.memory_space<any>>) target_semaphore(%13 : memref<!tpu.dma_semaphore, #tpu.memory_space<semaphore_mem>>)
    %c1_i32_10 = arith.constant 1 : i32
    %c1_i32_11 = arith.constant 1 : i32
    %c1_i32_12 = arith.constant 1 : i32
    %c0_i32_13 = arith.constant 0 : i32
    %14 = tpu.memref_slice %arg4[%c1_i32_10, %1, %c0_i32_13] : memref<2x2x128xf32, #tpu.memory_space<any>> -> memref<1x2x128xf32, #tpu.memory_space<any>>
    %15 = tpu.memref_squeeze %14 : memref<1x2x128xf32, #tpu.memory_space<any>> -> memref<2x128xf32, #tpu.memory_space<any>>
    %16 = tpu.memref_slice %arg5[%c1_i32_11, %c1_i32_12] : memref<2x2x!tpu.dma_semaphore, #tpu.memory_space<semaphore_mem>> -> memref<1x1x!tpu.dma_semaphore, #tpu.memory_space<semaphore_mem>>
    %17 = tpu.memref_squeeze %16 : memref<1x1x!tpu.dma_semaphore, #tpu.memory_space<semaphore_mem>> -> memref<!tpu.dma_semaphore, #tpu.memory_space<semaphore_mem>>
    tpu.enqueue_dma source(%arg2 : memref<2x128xf32, #tpu.memory_space<vmem>>) target(%15 : memref<2x128xf32, #tpu.memory_space<any>>) target_semaphore(%17 : memref<!tpu.dma_semaphore, #tpu.memory_space<semaphore_mem>>)
    %c0_i32_14 = arith.constant 0 : i32
    %c0_i32_15 = arith.constant 0 : i32
    %c0_i32_16 = arith.constant 0 : i32
    %c0_i32_17 = arith.constant 0 : i32
    %18 = tpu.memref_slice %arg3[%c0_i32_14, %0, %c0_i32_17] : memref<2x6x128xf32, #tpu.memory_space<any>> -> memref<1x6x128xf32, #tpu.memory_space<any>>
    %19 = tpu.memref_squeeze %18 : memref<1x6x128xf32, #tpu.memory_space<any>> -> memref<6x128xf32, #tpu.memory_space<any>>
    %20 = tpu.memref_slice %arg5[%c0_i32_15, %c0_i32_16] : memref<2x2x!tpu.dma_semaphore, #tpu.memory_space<semaphore_mem>> -> memref<1x1x!tpu.dma_semaphore, #tpu.memory_space<semaphore_mem>>
    %21 = tpu.memref_squeeze %20 : memref<1x1x!tpu.dma_semaphore, #tpu.memory_space<semaphore_mem>> -> memref<!tpu.dma_semaphore, #tpu.memory_space<semaphore_mem>>
    tpu.wait_dma2 semaphore(%21 : memref<!tpu.dma_semaphore, #tpu.memory_space<semaphore_mem>>) src(%arg1 : memref<6x128xf32, #tpu.memory_space<vmem>>) dst(%19 : memref<6x128xf32, #tpu.memory_space<any>>)
    %c0_i32_18 = arith.constant 0 : i32
    %c0_i32_19 = arith.constant 0 : i32
    %c1_i32_20 = arith.constant 1 : i32
    %c0_i32_21 = arith.constant 0 : i32
    %22 = tpu.memref_slice %arg4[%c0_i32_18, %1, %c0_i32_21] : memref<2x2x128xf32, #tpu.memory_space<any>> -> memref<1x2x128xf32, #tpu.memory_space<any>>
    %23 = tpu.memref_squeeze %22 : memref<1x2x128xf32, #tpu.memory_space<any>> -> memref<2x128xf32, #tpu.memory_space<any>>
    %24 = tpu.memref_slice %arg5[%c0_i32_19, %c1_i32_20] : memref<2x2x!tpu.dma_semaphore, #tpu.memory_space<semaphore_mem>> -> memref<1x1x!tpu.dma_semaphore, #tpu.memory_space<semaphore_mem>>
    %25 = tpu.memref_squeeze %24 : memref<1x1x!tpu.dma_semaphore, #tpu.memory_space<semaphore_mem>> -> memref<!tpu.dma_semaphore, #tpu.memory_space<semaphore_mem>>
    tpu.wait_dma2 semaphore(%25 : memref<!tpu.dma_semaphore, #tpu.memory_space<semaphore_mem>>) src(%arg2 : memref<2x128xf32, #tpu.memory_space<vmem>>) dst(%23 : memref<2x128xf32, #tpu.memory_space<any>>)
    %c1_i32_22 = arith.constant 1 : i32
    %c1_i32_23 = arith.constant 1 : i32
    %c0_i32_24 = arith.constant 0 : i32
    %c0_i32_25 = arith.constant 0 : i32
    %26 = tpu.memref_slice %arg3[%c1_i32_22, %0, %c0_i32_25] : memref<2x6x128xf32, #tpu.memory_space<any>> -> memref<1x6x128xf32, #tpu.memory_space<any>>
    %27 = tpu.memref_squeeze %26 : memref<1x6x128xf32, #tpu.memory_space<any>> -> memref<6x128xf32, #tpu.memory_space<any>>
    %28 = tpu.memref_slice %arg5[%c1_i32_23, %c0_i32_24] : memref<2x2x!tpu.dma_semaphore, #tpu.memory_space<semaphore_mem>> -> memref<1x1x!tpu.dma_semaphore, #tpu.memory_space<semaphore_mem>>
    %29 = tpu.memref_squeeze %28 : memref<1x1x!tpu.dma_semaphore, #tpu.memory_space<semaphore_mem>> -> memref<!tpu.dma_semaphore, #tpu.memory_space<semaphore_mem>>
    tpu.wait_dma2 semaphore(%29 : memref<!tpu.dma_semaphore, #tpu.memory_space<semaphore_mem>>) src(%arg1 : memref<6x128xf32, #tpu.memory_space<vmem>>) dst(%27 : memref<6x128xf32, #tpu.memory_space<any>>)
    %c1_i32_26 = arith.constant 1 : i32
    %c1_i32_27 = arith.constant 1 : i32
    %c1_i32_28 = arith.constant 1 : i32
    %c0_i32_29 = arith.constant 0 : i32
    %30 = tpu.memref_slice %arg4[%c1_i32_26, %1, %c0_i32_29] : memref<2x2x128xf32, #tpu.memory_space<any>> -> memref<1x2x128xf32, #tpu.memory_space<any>>
    %31 = tpu.memref_squeeze %30 : memref<1x2x128xf32, #tpu.memory_space<any>> -> memref<2x128xf32, #tpu.memory_space<any>>
    %32 = tpu.memref_slice %arg5[%c1_i32_27, %c1_i32_28] : memref<2x2x!tpu.dma_semaphore, #tpu.memory_space<semaphore_mem>> -> memref<1x1x!tpu.dma_semaphore, #tpu.memory_space<semaphore_mem>>
    %33 = tpu.memref_squeeze %32 : memref<1x1x!tpu.dma_semaphore, #tpu.memory_space<semaphore_mem>> -> memref<!tpu.dma_semaphore, #tpu.memory_space<semaphore_mem>>
    tpu.wait_dma2 semaphore(%33 : memref<!tpu.dma_semaphore, #tpu.memory_space<semaphore_mem>>) src(%arg2 : memref<2x128xf32, #tpu.memory_space<vmem>>) dst(%31 : memref<2x128xf32, #tpu.memory_space<any>>)
    return
  }
  func.func @transform_0(%arg0: i32) -> (i32, i32) {
    %c0_i32 = arith.constant 0 : i32
    %c0_i32_0 = arith.constant 0 : i32
    return %arg0, %c0_i32 : i32, i32
  }
  func.func @transform_1(%arg0: i32) -> (i32, i32) {
    %c0_i32 = arith.constant 0 : i32
    %c0_i32_0 = arith.constant 0 : i32
    return %arg0, %c0_i32 : i32, i32
  }
}

</mosaic_0001>

<bundles_post_ra>
// kernel: gaussian_forward.1
= control target key start
LH: loop header
LB: loop body
LE: loop exit
PB: predicated region body
PF: predicated region fallthrough
CT: control target
= control target key end

     0   :  { %s307_s0 = inlined_call_operand.vmem [shape: f32[6,128], index: 0, kind: input, shape index: {}]   ;;  %s308_s1 = inlined_call_operand.vmem [shape: f32[2,128], index: 1, kind: input, shape index: {}]   ;;  %s309_s2 = inlined_call_operand.vmem [shape: f32[2,6,128], index: 2, kind: output, shape index: {0}]   ;;  %s310_s3 = inlined_call_operand.hbm [shape: f32[2,2,128], index: 3, kind: output, shape index: {1}]  }
   0x1   :  { %v33_v0 = vld [vmem:[%s307_s0] sm:$0x3f] }
   0x2   :  { %34 = vst [vmem:[%s309_s2] sm:$0x3f] %v33_v0 }
   0x3   :  { %59 = vsyncadd [#allocation2], 96  ;;  %s70_s18 = sshll.u32 %s308_s1, 4  ;;  %v94_v1 = vld [vmem:[%s307_s0] sm:$0x3f]  ;;  %s71_s18 = int_to_ptr.vmem [resolvable:$true] %s70_s18 }
   0x4   :  { %197 = vst [vmem:[%s309_s2 + $0x8] sm:$0x3f] %v94_v1  ;;  %s202_s23 = scalar_lea.vmem %s71_s18, 32  ;;  %p207_p1 = scmp.lt.s32.totalorder %s71_s18, %s71_s18 }
   0x5   :  { %p203_p0 = scmp.ne.s32.totalorder %s71_s18, %s202_s23  ;;  %p208_p2 = scmp.lt.s32.totalorder %s202_s23, %s202_s23 }
   0x7   :  { %p209_p3 = por %p208_p2, %p207_p1 }
   0x9   :  { %p210_p4 = pnand %p209_p3, %p203_p0 }
   0xb   :  { %213 = shalt.err (!%p210_p4)  }
   0xc   :  { %s214_s1 = scalar_lea.hbm %s310_s3, 32  ;;  %s216_s29 = scalar_lea.hbm %s310_s3, 64 }
   0xd   :  { %p215_p5 = scmp.ne.s32.totalorder %s310_s3, %s214_s1  ;;  %p217_p6 = scmp.lt.u32.totalorder %s216_s29, %s214_s1 }
   0xe   :  { %p218_p7 = scmp.lt.u32.totalorder %s214_s1, %s310_s3 }
  0x10   :  { %p219_p8 = por %p218_p7, %p217_p6 }
  0x12   :  { %p220_p9 = pnand %p219_p8, %p215_p5 }
  0x14   :  { %223 = shalt.err (!%p220_p9)  }
  0x15   :  { %73 = dma.vmem_to_hbm [thread:$0]  %s71_s18, 32, %s310_s3, [#allocation2 + $0x1] }
  0x16   :  { %120 = vsyncadd [#allocation2 + $0x2], 96 }
  0x17   :  { %235 = shalt.err (!%p210_p4)  }
  0x18   :  { %p237_p10 = scmp.ne.s32.totalorder %s214_s1, %s216_s29  ;;  %p240_p11 = scmp.lt.u32.totalorder %s216_s29, %s216_s29 }
  0x1a   :  { %p241_p12 = por %p240_p11, %p218_p7 }
  0x1c   :  { %p243_p13 = por %p241_p12, %p217_p6 }
  0x1e   :  { %p244_p0 = pnand %p243_p13, %p237_p10 }
  0x20   :  { %247 = shalt.err (!%p244_p0)  }
  0x21   :  { %135 = dma.vmem_to_hbm [thread:$0]  %s71_s18, 32, %s214_s1, [#allocation2 + $0x3] }
  0x22   :  { %249 = dma.done.wait [#allocation2], 96 }
  0x23   :  { %250 = vsyncadd [#allocation2], 4294967200 }
  0x24   :  { %251 = dma.done.wait [#allocation2 + $0x1], 32 }
  0x25   :  { %252 = vsyncadd [#allocation2 + $0x1], 4294967264 }
  0x26   :  { %253 = dma.done.wait [#allocation2 + $0x2], 96 }
  0x27   :  { %254 = vsyncadd [#allocation2 + $0x2], 4294967200 }
  0x28   :  { %255 = dma.done.wait [#allocation2 + $0x3], 32 }
  0x29   :  { %256 = vsyncadd [#allocation2 + $0x3], 4294967264 }
  0x2a   :  { %146 = vsyncmov [#allocation2] }
  0x2d   :  { %s147_s6 = vpop.sfrf %146 }
  0x2e   :  { %p198_p1 = scmp.ne.s32.totalorder %s147_s6, 0 }
  0x30   :  { %151 = shalt.err (%p198_p1)  }
  0x31   :  { %153 = vsyncmov [#allocation2 + $0x1] }
  0x34   :  { %s154_s3 = vpop.sfrf %153 }
  0x35   :  { %p199_p2 = scmp.ne.s32.totalorder %s154_s3, 0 }
  0x37   :  { %158 = shalt.err (%p199_p2)  }
  0x38   :  { %160 = vsyncmov [#allocation2 + $0x2] }
  0x3b   :  { %s161_s7 = vpop.sfrf %160 }
  0x3c   :  { %p200_p3 = scmp.ne.s32.totalorder %s161_s7, 0 }
  0x3e   :  { %165 = shalt.err (%p200_p3)  }
  0x3f   :  { %167 = vsyncmov [#allocation2 + $0x3] }
  0x42   :  { %s168_s8 = vpop.sfrf %167 }
  0x43   :  { %p201_p4 = scmp.ne.s32.totalorder %s168_s8, 0 }
  0x45   :  { %172 = shalt.err (%p201_p4)  }

</bundles_post_ra>
